<compile_context>
chip_gen: v5e
topology: v5e:2x2
jax: 0.10.0
libtpu: 0.0.40
codegen_flags: <defaults>
</compile_context>

<pallas_src>
import functools

import jax
import jax.numpy as jnp
from jax.experimental import pallas as pl
from jax.experimental.pallas import tpu as pltpu


def _reg_horseshoe_kernel(x_ref, wt_ref, b_ref, wvar_ref, bvar_ref,
                          sqrt_rs_ref, eps_ref, o_ref):
    """One batch-tile of the regularized-horseshoe forward pass.

    x_ref       : (TB, Kp)  input tile (zero padded along K)
    wt_ref      : (Kp, Np)  weights mean, transposed, zero padded
    b_ref       : (1,  Np)  bias mean
    wvar_ref    : (Kp, Np)  exp(weights_logvar), transposed, zero padded
    bvar_ref    : (1,  Np)  exp(bias_logvar)
    sqrt_rs_ref : (1,  Np)  sqrt(c*s/(c+s))  -- precomputed in wrapper
    eps_ref     : (TB, Np)  N(0,1) noise for the activation reparameterization
    o_ref       : (TB, Np)  output tile
    """
    x = x_ref[...]                                                       # (TB, Kp)
    mu_act = jnp.dot(x, wt_ref[...],
                     preferred_element_type=jnp.float32) + b_ref[...]    # (TB, Np)
    var_act = jnp.dot(x * x, wvar_ref[...],
                      preferred_element_type=jnp.float32) + bvar_ref[...]
    # reparam(mu, log(var)): std = exp(0.5*log(var)) = sqrt(var)
    activ = mu_act + eps_ref[...] * jnp.sqrt(var_act)                    # (TB, Np)
    o_ref[...] = sqrt_rs_ref[...] * activ


def _round_up(v, m):
    return ((v + m - 1) // m) * m


def _pad_to(a, shape):
    return jnp.pad(a, [(0, s - d) for d, s in zip(a.shape, shape)])


def regularized_horseshoe_forward(x, params, eps_act, eps_scale, eps_c,
                                  *, block_b=256):
    """Wrapper: grid-invariant glue in plain JAX, hot path in Pallas."""
    B, K = x.shape
    N = params["bias"].shape[0]

    # ---- grid-invariant glue (done ONCE, outside the kernel) ---------------
    # regularized horseshoe per-node scale
    scale_mean = params["ns_mu"] + params["ls_mu"]                           # (N,)
    scale_var = jnp.exp(params["ns_log_sigma"]) ** 2 + \
        jnp.exp(params["ls_log_sigma"]) ** 2                                 # (N,)
    scale_sample = jnp.exp(scale_mean + eps_scale * jnp.sqrt(scale_var))     # (N,)
    # c_sample = exp(reparam(c.mu, 2*c.log_sigma)); std = exp(c.log_sigma)
    c_sample = jnp.exp(params["c_mu"] + eps_c * jnp.exp(params["c_log_sigma"]))
    reg_scale = c_sample * scale_sample / (c_sample + scale_sample)          # (N,)
    sqrt_rs = jnp.sqrt(reg_scale)                                            # (N,)

    # variational linear layer operands (exp hoisted out of the kernel)
    wt = params["weights"].T                                                 # (K, N)
    wvar_t = jnp.exp(params["weights_logvar"]).T                             # (K, N)
    bias = params["bias"]
    bias_var = jnp.exp(params["bias_logvar"])

    # ---- pad to TPU-friendly shapes (lane-dense N, full K contraction) -----
    Kp = _round_up(K, 128)
    Np = _round_up(N, 128)
    block_b = max(8, min(block_b, _round_up(B, 8)))
    block_b = _round_up(block_b, 8)
    Bp = _round_up(B, block_b)

    x_p = _pad_to(x, (Bp, Kp))
    eps_p = _pad_to(eps_act, (Bp, Np))
    wt_p = _pad_to(wt, (Kp, Np))
    wvar_p = _pad_to(wvar_t, (Kp, Np))
    bias_p = _pad_to(bias.reshape(1, N), (1, Np))
    bvar_p = _pad_to(bias_var.reshape(1, N), (1, Np))
    sqrt_rs_p = _pad_to(sqrt_rs.reshape(1, N), (1, Np))

    grid = (Bp // block_b,)
    tile_row = lambda i: (i, 0)   # noqa: E731
    fixed = lambda i: (0, 0)      # noqa: E731

    out_p = pl.pallas_call(
        _reg_horseshoe_kernel,
        out_shape=jax.ShapeDtypeStruct((Bp, Np), jnp.float32),
        grid_spec=pltpu.PrefetchScalarGridSpec(
            num_scalar_prefetch=0,
            grid=grid,
            in_specs=[
                pl.BlockSpec((block_b, Kp), tile_row),   # x tile
                pl.BlockSpec((Kp, Np), fixed),           # weights^T (resident)
                pl.BlockSpec((1, Np), fixed),            # bias
                pl.BlockSpec((Kp, Np), fixed),           # exp(weights_logvar)^T (resident)
                pl.BlockSpec((1, Np), fixed),            # exp(bias_logvar)
                pl.BlockSpec((1, Np), fixed),            # sqrt(reg_scale)
                pl.BlockSpec((block_b, Np), tile_row),   # eps_act tile
            ],
            out_specs=pl.BlockSpec((block_b, Np), tile_row),
        ),
        compiler_params=pltpu.CompilerParams(
            dimension_semantics=("parallel",),
            vmem_limit_bytes=64 * 1024 * 1024,
        ),
    )(x_p, wt_p, bias_p, wvar_p, bvar_p, sqrt_rs_p, eps_p)

    return out_p[:B, :N]


def reference_forward(x, p, eps_act, eps_scale, eps_c):
    """Pure-JAX mirror of RegularizedHorseshoeLayer.forward (do_sample=True)."""
    scale_mean = p["ns_mu"] + p["ls_mu"]
    scale_var = jnp.exp(p["ns_log_sigma"]) ** 2 + jnp.exp(p["ls_log_sigma"]) ** 2
    scale_sample = jnp.exp(scale_mean + eps_scale * jnp.sqrt(scale_var))
    c_sample = jnp.exp(p["c_mu"] + eps_c * jnp.exp(p["c_log_sigma"]))
    reg_scale = c_sample * scale_sample / (c_sample + scale_sample)
    mu_act = x @ p["weights"].T + p["bias"]
    var_act = (x * x) @ jnp.exp(p["weights_logvar"]).T + jnp.exp(p["bias_logvar"])
    activ = mu_act + eps_act * jnp.sqrt(var_act)
    return jnp.sqrt(reg_scale) * activ


def init_params(key, in_features, out_features):
    """Deterministic synthetic init mirroring BayesianLinearLayer/Horseshoe __init__."""
    ks = jax.random.split(key, 10)
    prior_stdv = 1.0 / jnp.sqrt(jnp.float32(in_features))
    return {
        # BayesianLinearLayer params
        "weights": prior_stdv * jax.random.normal(ks[0], (out_features, in_features), jnp.float32),
        "bias": jax.random.normal(ks[1], (out_features,), jnp.float32),
        "weights_logvar": -9.0 + 0.01 * jax.random.normal(ks[2], (out_features, in_features), jnp.float32),
        "bias_logvar": -9.0 + 0.01 * jax.random.normal(ks[3], (out_features,), jnp.float32),
        # HorseshoeLayer: InvGammaHalfCauchyLayer(out_features) / (1)
        "ns_mu": 0.1 * jax.random.normal(ks[4], (out_features,), jnp.float32),
        "ns_log_sigma": -3.0 + 0.1 * jax.random.normal(ks[5], (out_features,), jnp.float32),
        "ls_mu": 0.1 * jax.random.normal(ks[6], (1,), jnp.float32),
        "ls_log_sigma": -3.0 + 0.1 * jax.random.normal(ks[7], (1,), jnp.float32),
        # RegularizedHorseshoeLayer: InvGammaLayer c  (c_a=2.0, c_b=6.0)
        "c_mu": jnp.log(jnp.array([6.0 / (2.0 - 1.0)], jnp.float32)) +
                0.05 * jax.random.normal(ks[8], (1,), jnp.float32),
        "c_log_sigma": -3.0 + 0.1 * jax.random.normal(ks[9], (1,), jnp.float32),
    }


if __name__ == "__main__":
    B, K, N = 16, 32, 48   # batch, in_features, out_features (small demo shapes)

    root = jax.random.PRNGKey(0)
    k_param, k_x, k_ea, k_es, k_ec = jax.random.split(root, 5)

    params = init_params(k_param, K, N)
    x = jax.random.normal(k_x, (B, K), jnp.float32)

    # reparameterization noise (the torch module draws these with .normal_();
    # here they are explicit deterministic inputs so kernel == reference)
    eps_act = jax.random.normal(k_ea, (B, N), jnp.float32)
    eps_scale = jax.random.normal(k_es, (N,), jnp.float32)
    eps_c = jax.random.normal(k_ec, (1,), jnp.float32)

    fwd = jax.jit(functools.partial(regularized_horseshoe_forward, block_b=256))
    out = fwd(x, params, eps_act, eps_scale, eps_c)
    out = jax.block_until_ready(out)

    ref = jax.block_until_ready(
        reference_forward(x, params, eps_act, eps_scale, eps_c))

    assert out.shape == (B, N) and out.dtype == jnp.float32
    assert jnp.allclose(out, ref, rtol=1e-3, atol=1e-3), \
        f"max abs err = {jnp.max(jnp.abs(out - ref))}"

    print("KERNEL_OK")
</pallas_src>

<mosaic_0001>
module attributes {stable_mosaic.version = 11 : i64} {
  func.func @_reg_horseshoe_kernel(%arg0: i32, %arg1: memref<16x128xf32, #tpu.memory_space<vmem>>, %arg2: memref<128x128xf32, #tpu.memory_space<vmem>>, %arg3: memref<1x128xf32, #tpu.memory_space<vmem>>, %arg4: memref<128x128xf32, #tpu.memory_space<vmem>>, %arg5: memref<1x128xf32, #tpu.memory_space<vmem>>, %arg6: memref<1x128xf32, #tpu.memory_space<vmem>>, %arg7: memref<16x128xf32, #tpu.memory_space<vmem>>, %arg8: memref<16x128xf32, #tpu.memory_space<vmem>>) attributes {dimension_semantics = [#tpu.dimension_semantics<parallel>], iteration_bounds = array<i64: 1>, scalar_prefetch = 0 : i64, scratch_operands = 0 : i64, tpu.core_type = #tpu.core_type<tc>, window_params = [{transform_indices = @transform_0, window_bounds = array<i64: 16, 128>}, {pipeline_mode = #tpu.pipeline_mode<synchronous>, transform_indices = @transform_1, window_bounds = array<i64: 128, 128>}, {pipeline_mode = #tpu.pipeline_mode<synchronous>, transform_indices = @transform_2, window_bounds = array<i64: 1, 128>}, {pipeline_mode = #tpu.pipeline_mode<synchronous>, transform_indices = @transform_3, window_bounds = array<i64: 128, 128>}, {pipeline_mode = #tpu.pipeline_mode<synchronous>, transform_indices = @transform_4, window_bounds = array<i64: 1, 128>}, {pipeline_mode = #tpu.pipeline_mode<synchronous>, transform_indices = @transform_5, window_bounds = array<i64: 1, 128>}, {transform_indices = @transform_6, window_bounds = array<i64: 16, 128>}, {transform_indices = @transform_7, window_bounds = array<i64: 16, 128>}]} {
    %c0 = arith.constant 0 : index
    %c0_0 = arith.constant 0 : index
    %0 = vector.load %arg1[%c0, %c0_0] : memref<16x128xf32, #tpu.memory_space<vmem>>, vector<16x128xf32>
    %c0_1 = arith.constant 0 : index
    %c0_2 = arith.constant 0 : index
    %1 = vector.load %arg2[%c0_1, %c0_2] : memref<128x128xf32, #tpu.memory_space<vmem>>, vector<128x128xf32>
    %cst = arith.constant dense<0.000000e+00> : vector<16x128xf32>
    %2 = tpu.matmul %0, %1, %cst {dimension_numbers = #tpu.dot_dimension_numbers<[1], [0], [0], [1], [0, 0, 1, 1], [], []>} : vector<16x128xf32>, vector<128x128xf32>, vector<16x128xf32> -> vector<16x128xf32>
    %c0_3 = arith.constant 0 : index
    %c0_4 = arith.constant 0 : index
    %3 = vector.load %arg3[%c0_3, %c0_4] : memref<1x128xf32, #tpu.memory_space<vmem>>, vector<1x128xf32>
    %4 = vector.broadcast %3 : vector<1x128xf32> to vector<16x128xf32>
    %5 = arith.addf %2, %4 : vector<16x128xf32>
    %6 = arith.mulf %0, %0 : vector<16x128xf32>
    %c0_5 = arith.constant 0 : index
    %c0_6 = arith.constant 0 : index
    %7 = vector.load %arg4[%c0_5, %c0_6] : memref<128x128xf32, #tpu.memory_space<vmem>>, vector<128x128xf32>
    %cst_7 = arith.constant dense<0.000000e+00> : vector<16x128xf32>
    %8 = tpu.matmul %6, %7, %cst_7 {dimension_numbers = #tpu.dot_dimension_numbers<[1], [0], [0], [1], [0, 0, 1, 1], [], []>} : vector<16x128xf32>, vector<128x128xf32>, vector<16x128xf32> -> vector<16x128xf32>
    %c0_8 = arith.constant 0 : index
    %c0_9 = arith.constant 0 : index
    %9 = vector.load %arg5[%c0_8, %c0_9] : memref<1x128xf32, #tpu.memory_space<vmem>>, vector<1x128xf32>
    %10 = vector.broadcast %9 : vector<1x128xf32> to vector<16x128xf32>
    %11 = arith.addf %8, %10 : vector<16x128xf32>
    %c0_10 = arith.constant 0 : index
    %c0_11 = arith.constant 0 : index
    %12 = vector.load %arg7[%c0_10, %c0_11] : memref<16x128xf32, #tpu.memory_space<vmem>>, vector<16x128xf32>
    %13 = math.sqrt %11 : vector<16x128xf32>
    %14 = arith.mulf %12, %13 : vector<16x128xf32>
    %15 = arith.addf %5, %14 : vector<16x128xf32>
    %c0_12 = arith.constant 0 : index
    %c0_13 = arith.constant 0 : index
    %16 = vector.load %arg6[%c0_12, %c0_13] : memref<1x128xf32, #tpu.memory_space<vmem>>, vector<1x128xf32>
    %17 = vector.broadcast %16 : vector<1x128xf32> to vector<16x128xf32>
    %18 = arith.mulf %17, %15 : vector<16x128xf32>
    %c0_14 = arith.constant 0 : index
    %c0_15 = arith.constant 0 : index
    %19 = vector.load %arg8[%c0_14, %c0_15] : memref<16x128xf32, #tpu.memory_space<vmem>>, vector<16x128xf32>
    tpu.vector_store %arg8[%c0_14, %c0_15], %18 {strides = array<i32>} : memref<16x128xf32, #tpu.memory_space<vmem>>, vector<16x128xf32>,
    return
  }
  func.func @transform_0(%arg0: i32) -> (i32, i32) {
    %c0_i32 = arith.constant 0 : i32
    %c0_i32_0 = arith.constant 0 : i32
    return %arg0, %c0_i32 : i32, i32
  }
  func.func @transform_1(%arg0: i32) -> (i32, i32) {
    %c0_i32 = arith.constant 0 : i32
    %c0_i32_0 = arith.constant 0 : i32
    %c0_i32_1 = arith.constant 0 : i32
    return %c0_i32, %c0_i32_0 : i32, i32
  }
  func.func @transform_2(%arg0: i32) -> (i32, i32) {
    %c0_i32 = arith.constant 0 : i32
    %c0_i32_0 = arith.constant 0 : i32
    %c0_i32_1 = arith.constant 0 : i32
    return %c0_i32, %c0_i32_0 : i32, i32
  }
  func.func @transform_3(%arg0: i32) -> (i32, i32) {
    %c0_i32 = arith.constant 0 : i32
    %c0_i32_0 = arith.constant 0 : i32
    %c0_i32_1 = arith.constant 0 : i32
    return %c0_i32, %c0_i32_0 : i32, i32
  }
  func.func @transform_4(%arg0: i32) -> (i32, i32) {
    %c0_i32 = arith.constant 0 : i32
    %c0_i32_0 = arith.constant 0 : i32
    %c0_i32_1 = arith.constant 0 : i32
    return %c0_i32, %c0_i32_0 : i32, i32
  }
  func.func @transform_5(%arg0: i32) -> (i32, i32) {
    %c0_i32 = arith.constant 0 : i32
    %c0_i32_0 = arith.constant 0 : i32
    %c0_i32_1 = arith.constant 0 : i32
    return %c0_i32, %c0_i32_0 : i32, i32
  }
  func.func @transform_6(%arg0: i32) -> (i32, i32) {
    %c0_i32 = arith.constant 0 : i32
    %c0_i32_0 = arith.constant 0 : i32
    return %arg0, %c0_i32 : i32, i32
  }
  func.func @transform_7(%arg0: i32) -> (i32, i32) {
    %c0_i32 = arith.constant 0 : i32
    %c0_i32_0 = arith.constant 0 : i32
    return %arg0, %c0_i32 : i32, i32
  }
}

</mosaic_0001>

<bundles_post_ra>
// kernel: regularized_horseshoe_forward.1
= control target key start
LH: loop header
LB: loop body
LE: loop exit
PB: predicated region body
PF: predicated region fallthrough
CT: control target
= control target key end

     0   :  { %s404_s0 = inlined_call_operand.vmem [shape: f32[16,128], index: 0, kind: input, shape index: {}]   ;;  %s405_s1 = inlined_call_operand.vmem [shape: f32[128,128], index: 1, kind: input, shape index: {}]   ;;  %s406_s2 = inlined_call_operand.vmem [shape: f32[1,128], index: 2, kind: input, shape index: {}]   ;;  %s407_s3 = inlined_call_operand.vmem [shape: f32[128,128], index: 3, kind: input, shape index: {}]   ;;  %s408_s4 = inlined_call_operand.vmem [shape: f32[1,128], index: 4, kind: input, shape index: {}]   ;;  %s409_s5 = inlined_call_operand.vmem [shape: f32[1,128], index: 5, kind: input, shape index: {}]   ;;  %s410_s6 = inlined_call_operand.vmem [shape: f32[16,128], index: 6, kind: input, shape index: {}]   ;;  %s411_s7 = inlined_call_operand.hbm [shape: f32[16,128], index: 7, kind: output, shape index: {}]  }
   0x1   :  { %v89_v0 = vld [vmem:[%s407_s3 + $0x78] sm:$0xff]  ;;  %v88_v1 = vld [vmem:[%s407_s3 + $0x70] sm:$0xff]  ;;  %v87_v2 = vld [vmem:[%s407_s3 + $0x68] sm:$0xff] }
   0x2   :  { %94 = vmatpush.msra.mxu1 %v89_v0  ;;  %189 = vmatpush.msra.mxu3 %v89_v0  ;;  %v86_v3 = vld [vmem:[%s407_s3 + $0x60] sm:$0xff]  ;;  %v44_v4 = vld [vmem:[%s405_s1 + $0x78] sm:$0xff]  ;;  %v43_v5 = vld [vmem:[%s405_s1 + $0x70] sm:$0xff] }
   0x3   :  { %v85_v6 = vld [vmem:[%s407_s3 + $0x58] sm:$0xff]  ;;  %49 = vmatpush.msra.mxu0 %v44_v4  ;;  %173 = vmatpush.msra.mxu2 %v44_v4  ;;  %v42_v7 = vld [vmem:[%s405_s1 + $0x68] sm:$0xff]  ;;  %v84_v8 = vld [vmem:[%s407_s3 + $0x50] sm:$0xff] }
   0x4   :  { %95 = vmatpush.msra.mxu1 %v88_v1  ;;  %190 = vmatpush.msra.mxu3 %v88_v1  ;;  %v41_v9 = vld [vmem:[%s405_s1 + $0x60] sm:$0xff]  ;;  %v83_v10 = vld [vmem:[%s407_s3 + $0x48] sm:$0xff]  ;;  %v40_v12 = vld [vmem:[%s405_s1 + $0x58] sm:$0xff] }
   0x5   :  { %50 = vmatpush.msra.mxu0 %v43_v5  ;;  %174 = vmatpush.msra.mxu2 %v43_v5  ;;  %v82_v11 = vld [vmem:[%s407_s3 + $0x40] sm:$0xff] }
   0x6   :  { %96 = vmatpush.msra.mxu1 %v87_v2  ;;  %191 = vmatpush.msra.mxu3 %v87_v2 }
   0x7   :  { %51 = vmatpush.msra.mxu0 %v42_v7  ;;  %175 = vmatpush.msra.mxu2 %v42_v7 }
   0x8   :  { %97 = vmatpush.msra.mxu1 %v86_v3  ;;  %192 = vmatpush.msra.mxu3 %v86_v3 }
   0x9   :  { %52 = vmatpush.msra.mxu0 %v41_v9  ;;  %176 = vmatpush.msra.mxu2 %v41_v9 }
   0xa   :  { %98 = vmatpush.msra.mxu1 %v85_v6  ;;  %193 = vmatpush.msra.mxu3 %v85_v6 }
   0xc   :  { %99 = vmatpush.msra.mxu1 %v84_v8  ;;  %194 = vmatpush.msra.mxu3 %v84_v8 }
   0xd   :  { %12 = vsyncpa [#allocation3], 0  ;;  %v39_v13 = vld [vmem:[%s405_s1 + $0x50] sm:$0xff]  ;;  %v81_v14 = vld [vmem:[%s407_s3 + $0x38] sm:$0xff]  ;;  %53 = vmatpush.msra.mxu0 %v40_v12  ;;  %177 = vmatpush.msra.mxu2 %v40_v12  ;;  %s241_s28 = smov [#allocation2]   ;;  %s161_s8 = sshll.u32 %s411_s7, 4  ;;  %s162_s8 = int_to_ptr.hbm [resolvable:$true] %s161_s8 }
   0xe   :  { %100 = vmatpush.msra.mxu1 %v83_v10  ;;  %195 = vmatpush.msra.mxu3 %v83_v10  ;;  %v38_v15 = vld [vmem:[%s405_s1 + $0x48] sm:$0xff]  ;;  %v80_v16 = vld [vmem:[%s407_s3 + $0x30] sm:$0xff]  ;;  %v37_v17 = vld [vmem:[%s405_s1 + $0x40] sm:$0xff]  ;;  %s159_s29 = sshll.u32 %s241_s28, 4  ;;  %s243_s9 = smov 8   ;;  %s160_s29 = int_to_ptr.vmem [resolvable:$true] %s159_s29 }
   0xf   :  { %54 = vmatpush.msra.mxu0 %v39_v13  ;;  %178 = vmatpush.msra.mxu2 %v39_v13  ;;  %v79_v18 = vld [vmem:[%s407_s3 + $0x28] sm:$0xff]  ;;  %v36_v19 = vld [vmem:[%s405_s1 + $0x38] sm:$0xff]  ;;  %v78_v20 = vld [vmem:[%s407_s3 + $0x20] sm:$0xff] }
  0x10   :  { %101 = vmatpush.msra.mxu1 %v82_v11  ;;  %196 = vmatpush.msra.mxu3 %v82_v11  ;;  %v35_v21 = vld [vmem:[%s405_s1 + $0x30] sm:$0xff]  ;;  %v77_v22 = vld [vmem:[%s407_s3 + $0x18] sm:$0xff]  ;;  %v34_v23 = vld [vmem:[%s405_s1 + $0x28] sm:$0xff] }
  0x11   :  { %55 = vmatpush.msra.mxu0 %v38_v15  ;;  %179 = vmatpush.msra.mxu2 %v38_v15  ;;  %v76_v24 = vld [vmem:[%s407_s3 + $0x10] sm:$0xff]  ;;  %v27_v25 = vld [vmem:[%s404_s0] sm:$0xff]  ;;  %v28_v26 = vld [vmem:[%s404_s0 + $0x8] sm:$0xff] }
  0x12   :  { %102 = vmatpush.msra.mxu1 %v81_v14  ;;  %197 = vmatpush.msra.mxu3 %v81_v14  ;;  %v33_v27 = vld [vmem:[%s405_s1 + $0x20] sm:$0xff]  ;;  %v75_v28 = vld [vmem:[%s407_s3 + $0x8] sm:$0xff]  ;;  %v32_v29 = vld [vmem:[%s405_s1 + $0x18] sm:$0xff]  ;;  %v72_v31 = vmul.f32 %v27_v25, %v27_v25  ;;  %v73_v32 = vmul.f32 %v28_v26, %v28_v26 }
  0x13   :  { %56 = vmatpush.msra.mxu0 %v37_v17  ;;  %180 = vmatpush.msra.mxu2 %v37_v17  ;;  %v74_v30 = vld [vmem:[%s407_s3] sm:$0xff]  ;;  %v31_v33 = vld [vmem:[%s405_s1 + $0x10] sm:$0xff]  ;;  %v30_v34 = vld [vmem:[%s405_s1 + $0x8] sm:$0xff] }
  0x14   :  { %103 = vmatpush.msra.mxu1 %v80_v16  ;;  %198 = vmatpush.msra.mxu3 %v80_v16  ;;  %v29_v35 = vld [vmem:[%s405_s1] sm:$0xff]  ;;  %v118_v2 = vld [vmem:[%s410_s6 + $0x8] sm:$0xff] }
  0x15   :  { %57 = vmatpush.msra.mxu0 %v36_v19  ;;  %181 = vmatpush.msra.mxu2 %v36_v19  ;;  %v208_v36 = vld [vmem:[%s408_s4] ss:$0 sm:$0xff] }
  0x16   :  { %104 = vmatpush.msra.mxu1 %v79_v18  ;;  %199 = vmatpush.msra.mxu3 %v79_v18  ;;  %v209_v48 = vld [vmem:[%s406_s2] ss:$0 sm:$0xff] }
  0x17   :  { %58 = vmatpush.msra.mxu0 %v35_v21  ;;  %182 = vmatpush.msra.mxu2 %v35_v21  ;;  %v117_v54 = vld [vmem:[%s410_s6] sm:$0xff]  ;;  %s242_s6 = smov 128  }
  0x18   :  { %105 = vmatpush.msra.mxu1 %v78_v20  ;;  %200 = vmatpush.msra.mxu3 %v78_v20  ;;  %v210_v61 = vld [vmem:[%s409_s5] ss:$0 sm:$0xff] }
  0x19   :  { %59 = vmatpush.msra.mxu0 %v34_v23  ;;  %183 = vmatpush.msra.mxu2 %v34_v23 }
  0x1a   :  { %106 = vmatpush.msra.mxu1 %v77_v22  ;;  %201 = vmatpush.msra.mxu3 %v77_v22 }
  0x1b   :  { %60 = vmatpush.msra.mxu0 %v33_v27  ;;  %184 = vmatpush.msra.mxu2 %v33_v27 }
  0x1c   :  { %107 = vmatpush.msra.mxu1 %v76_v24  ;;  %202 = vmatpush.msra.mxu3 %v76_v24 }
  0x1d   :  { %61 = vmatpush.msra.mxu0 %v32_v29  ;;  %185 = vmatpush.msra.mxu2 %v32_v29 }
  0x1e   :  { %108 = vmatpush.msra.mxu1 %v75_v28  ;;  %203 = vmatpush.msra.mxu3 %v75_v28 }
  0x1f   :  { %62 = vmatpush.msra.mxu0 %v31_v33  ;;  %186 = vmatpush.msra.mxu2 %v31_v33 }
  0x20   :  { %109 = vmatpush.msra.mxu1 %v74_v30  ;;  %204 = vmatpush.msra.mxu3 %v74_v30 }
  0x21   :  { %110 = vmatmul.f32.vlgmr.msra.gmra.mxu1 %v72_v31  ;;  %113 = vmatmul.f32.vlgmr.msra.gmra.mxu3 %v73_v32 }
  0x22   :  { %63 = vmatpush.msra.mxu0 %v30_v34  ;;  %187 = vmatpush.msra.mxu2 %v30_v34 }
  0x24   :  { %64 = vmatpush.msra.mxu0 %v29_v35  ;;  %188 = vmatpush.msra.mxu2 %v29_v35 }
  0x25   :  { %65 = vmatmul.f32.vlgmr.msra.gmra.mxu0 %v27_v25  ;;  %68 = vmatmul.f32.vlgmr.msra.gmra.mxu2 %v28_v26 }
  0x9e   :  { %v111_v37 = vpop.f32.mrf.mxu1 }
  0x9f   :  { %v112_v38 = vadd.f32 %v208_v36, %v111_v37 }
  0xa1   :  { %211 = vrsqrt.f32 %v112_v38  ;;  %vm126_vm0 = vcmp.eq.f32.partialorder %v112_v38, inf  ;;  %v129_v55 = vand.u32 2147483648, %v112_v38  ;;  %vm128_vm1 = vcmp.eq.f32.partialorder %v112_v38, 0.0 }
  0xa2   :  { %v66_v51 = vpop.f32.mrf.mxu0 }
  0xa3   :  { %v67_v56 = vadd.f32 %v209_v48, %v66_v51 }
  0xa4   :  { %v114_v39 = vpop.f32.mrf.mxu3 }
  0xa5   :  { %v115_v40 = vadd.f32 %v208_v36, %v114_v39 }
  0xa7   :  { %v212_v41 = vpop.eup %211  ;;  %213 = vrsqrt.f32 %v115_v40  ;;  %vm138_vm2 = vcmp.eq.f32.partialorder %v115_v40, inf  ;;  %v141_v3 = vand.u32 2147483648, %v115_v40  ;;  %vm140_vm3 = vcmp.eq.f32.partialorder %v115_v40, 0.0 }
  0xa8   :  { %v120_v42 = vmul.f32 %v212_v41, %v112_v38  ;;  %v69_v63 = vpop.f32.mrf.mxu2 }
  0xa9   :  { %v70_v5 = vadd.f32 %v209_v48, %v69_v63 }
  0xaa   :  { %v121_v43 = vmul.f32 %v212_v41, %v120_v42 }
  0xac   :  { %v122_v44 = vmul.f32 0.5, %v121_v43 }
  0xad   :  { %v214_v45 = vpop.eup %213 }
  0xae   :  { %v123_v46 = vsub.f32 1.5, %v122_v44  ;;  %v132_v47 = vmul.f32 %v214_v45, %v115_v40 }
  0xb0   :  { %v124_v49 = vmul.f32 %v212_v41, %v123_v46  ;;  %v133_v50 = vmul.f32 %v214_v45, %v132_v47 }
  0xb2   :  { %v125_v52 = vmul.f32 %v124_v49, %v112_v38  ;;  %v134_v53 = vmul.f32 0.5, %v133_v50 }
  0xb4   :  { %v127_v57 = vsel %vm126_vm0, %v112_v38, %v125_v52  ;;  %v135_v58 = vsub.f32 1.5, %v134_v53 }
  0xb5   :  { %v130_v59 = vsel %vm128_vm1, %v129_v55, %v127_v57 }
  0xb6   :  { %v143_v60 = vmul.f32 %v130_v59, %v117_v54  ;;  %v136_v62 = vmul.f32 %v214_v45, %v135_v58 }
  0xb8   :  { %v145_v0 = vadd.f32 %v143_v60, %v67_v56  ;;  %v137_v1 = vmul.f32 %v136_v62, %v115_v40 }
  0xba   :  { %v151_v4 = vmul.f32 %v210_v61, %v145_v0  ;;  %v139_v6 = vsel %vm138_vm2, %v115_v40, %v137_v1 }
  0xbb   :  { %v142_v7 = vsel %vm140_vm3, %v141_v3, %v139_v6 }
  0xbc   :  { %153 = vst [vmem:[#allocation2] sm:$0xff] %v151_v4  ;;  %v144_v8 = vmul.f32 %v142_v7, %v118_v2 }
  0xbe   :  { %v146_v9 = vadd.f32 %v144_v8, %v70_v5 }
  0xc0   :  { %v152_v10 = vmul.f32 %v210_v61, %v146_v9 }
  0xc2   :  { %154 = vst [vmem:[#allocation2 + $0x8] sm:$0xff] %v152_v10 }
  0xc3   :  { %167 = dma.vmem_to_hbm [thread:$0]  %s160_s29, 256, %s162_s8, [#allocation3], %s242_s6, %s242_s6, %s243_s9  }
  0xc4   :  { %239 = dma.done.wait [#allocation3], 256  }
  0xc5   :  { %240 = vsyncadd [#allocation3], 4294967040 }
  0xc6   :  { %172 = vsyncpa [#allocation3], 1 }

</bundles_post_ra>
